<compile_context>
chip_gen: v7x
topology: tpu7x:2x2x1
jax: 0.10.0
libtpu: 0.0.40
codegen_flags: <defaults>
</compile_context>

<pallas_src>
import functools
import math

import jax
import jax.numpy as jnp
from jax import lax
from jax.experimental import pallas as pl
from jax.experimental.pallas import tpu as pltpu


def _round_up(x: int, mult: int) -> int:
    return (x + mult - 1) // mult * mult


# ---------------------------------------------------------------------------
# ONINorm kernel
# ---------------------------------------------------------------------------
def _oni_kernel(z_ref, w_ref, *, T: int, eps: float,
                n_true: int, m_true: int, mxu_bf16: bool):
    # z_ref / w_ref: (Gb, n_pad, m_pad) block of Gb norm groups.
    Z = z_ref[...].astype(jnp.float32)
    Gb, n_pad, m_pad = Z.shape

    # Center along the last dim. Padded columns are zero so the row sum is
    # already correct; divide by the TRUE width, not the padded one.
    row_mean = jnp.sum(Z, axis=-1, keepdims=True) * (1.0 / float(m_true))
    Zc = Z - row_mean
    if m_pad != m_true:
        col_m = lax.broadcasted_iota(jnp.int32, (n_pad, m_pad), 1)
        Zc = jnp.where((col_m < m_true)[None], Zc, 0.0)

    Zc_mm = Zc.astype(jnp.bfloat16) if mxu_bf16 else Zc

    # Gram matrix S = Zc @ Zc^T per group (contraction over m, on the MXU).
    S = jnp.einsum('gnm,gkm->gnk', Zc_mm, Zc_mm,
                   preferred_element_type=jnp.float32)

    # Identity via 2-D broadcasted iota (TPU-friendly).
    row = lax.broadcasted_iota(jnp.int32, (n_pad, n_pad), 0)
    col = lax.broadcasted_iota(jnp.int32, (n_pad, n_pad), 1)
    eye2 = (row == col).astype(jnp.float32)
    if n_pad != n_true:
        # eps only on the true diagonal block (padded rows stay decoupled).
        eps_eye = jnp.where((row == col) & (row < n_true), eps, 0.0)
    else:
        eps_eye = eps * eye2
    S = S + eps_eye[None]

    # Frobenius normalization, with the scaling folded:
    #   S_hat = S / ||S||_F ,  final W scale 1/sqrt(||S||_F) goes into B
    #   (an (n,n) multiply + EUP rsqrt instead of an (n,m) divide).
    norm_sq = jnp.sum(S * S, axis=(1, 2), keepdims=True)      # (Gb,1,1)
    inv_norm = lax.rsqrt(norm_sq)                              # 1/||S||_F
    S = S * inv_norm

    B0 = jnp.broadcast_to(eye2[None], (Gb, n_pad, n_pad))

    def newton_body(_, Bc):
        B2 = jnp.einsum('gij,gjk->gik', Bc, Bc,
                        preferred_element_type=jnp.float32)
        B3 = jnp.einsum('gij,gjk->gik', B2, Bc,
                        preferred_element_type=jnp.float32)
        return 1.5 * Bc - 0.5 * jnp.einsum('gij,gjk->gik', B3, S,
                                           preferred_element_type=jnp.float32)

    B = lax.fori_loop(0, T, newton_body, B0, unroll=True)

    # Fold 1/sqrt(||S||_F) into B before the final (n,m) matmul.
    B = B * jnp.sqrt(inv_norm)
    B_mm = B.astype(jnp.bfloat16) if mxu_bf16 else B
    W = jnp.einsum('gij,gjm->gim', B_mm, Zc_mm,
                   preferred_element_type=jnp.float32)
    w_ref[...] = W.astype(w_ref.dtype)


def oni_norm(weight: jax.Array, T: int = 5, norm_groups: int = 1,
             eps: float = 1e-5, mxu_bf16: bool = False) -> jax.Array:
    """Pallas ONINorm forward. weight: (out_dim, ...) any trailing dims."""
    G = norm_groups
    assert weight.shape[0] % G == 0
    n = weight.shape[0] // G
    m = 1
    for d in weight.shape[1:]:
        m *= int(d)

    Z = weight.reshape(G, n, m)

    # Pad to (8, 128)-aligned tiles for lane-dense loads/stores.
    n_pad = _round_up(n, 8)
    m_pad = _round_up(m, 128)
    if (n_pad, m_pad) != (n, m):
        Z = jnp.pad(Z, ((0, 0), (0, n_pad - n), (0, m_pad - m)))

    # Batch several groups per grid step (amortize per-step overhead).
    Gb = 1
    for cand in (16, 8, 4, 2, 1):
        if G % cand == 0:
            Gb = cand
            break
    grid = (G // Gb,)
    block = (Gb, n_pad, m_pad)

    # Rough VMEM estimate (double-buffered in/out slabs + in-kernel temps);
    # only raise the scoped limit if the 16 MiB default would be exceeded.
    slab = Gb * n_pad * m_pad * 4
    gram = Gb * n_pad * n_pad * 4
    est = 6 * slab + 6 * gram
    vmem_limit = None
    if est > 16 * 1024 * 1024:
        vmem_limit = int(min(est * 1.25, 64 * 1024 * 1024))

    kernel = functools.partial(_oni_kernel, T=T, eps=eps,
                               n_true=n, m_true=m, mxu_bf16=mxu_bf16)

    out = pl.pallas_call(
        kernel,
        out_shape=jax.ShapeDtypeStruct((G, n_pad, m_pad), weight.dtype),
        grid_spec=pltpu.PrefetchScalarGridSpec(
            num_scalar_prefetch=0,
            grid=grid,
            in_specs=[pl.BlockSpec(block, lambda g: (g, 0, 0))],
            out_specs=pl.BlockSpec(block, lambda g: (g, 0, 0)),
        ),
        compiler_params=pltpu.CompilerParams(
            dimension_semantics=("parallel",),
            vmem_limit_bytes=vmem_limit),
    )(Z)

    return out[:, :n, :m].reshape(weight.shape)


# ---------------------------------------------------------------------------
# Tiled MXU matmul (used for x @ weight and adj @ support)
# ---------------------------------------------------------------------------
def _matmul_kernel(a_ref, b_ref, o_ref, acc_ref):
    @pl.when(pl.program_id(2) == 0)
    def _():
        acc_ref[...] = jnp.zeros_like(acc_ref)

    acc_ref[...] += jnp.dot(a_ref[...], b_ref[...],
                            preferred_element_type=jnp.float32)

    @pl.when(pl.program_id(2) == pl.num_programs(2) - 1)
    def _():
        o_ref[...] = acc_ref[...].astype(o_ref.dtype)


def pallas_matmul(a: jax.Array, b: jax.Array,
                  tm: int = 128, tn: int = 128, tk: int = 128) -> jax.Array:
    M, K = a.shape
    K2, N = b.shape
    assert K == K2
    Mp, Kp, Np = _round_up(M, tm), _round_up(K, tk), _round_up(N, tn)
    a_p = jnp.pad(a, ((0, Mp - M), (0, Kp - K))) if (Mp, Kp) != (M, K) else a
    b_p = jnp.pad(b, ((0, Kp - K), (0, Np - N))) if (Kp, Np) != (K, N) else b

    out = pl.pallas_call(
        _matmul_kernel,
        out_shape=jax.ShapeDtypeStruct((Mp, Np), a.dtype),
        grid_spec=pltpu.PrefetchScalarGridSpec(
            num_scalar_prefetch=0,
            grid=(Mp // tm, Np // tn, Kp // tk),
            in_specs=[pl.BlockSpec((tm, tk), lambda i, j, k: (i, k)),
                      pl.BlockSpec((tk, tn), lambda i, j, k: (k, j))],
            out_specs=pl.BlockSpec((tm, tn), lambda i, j, k: (i, j)),
            scratch_shapes=[pltpu.VMEM((tm, tn), jnp.float32)]),
        compiler_params=pltpu.CompilerParams(
            dimension_semantics=("parallel", "parallel", "arbitrary")),
    )(a_p, b_p)
    return out[:M, :N]


# ---------------------------------------------------------------------------
# GraphConvolution1 forward
# ---------------------------------------------------------------------------
def graph_convolution1_forward(x, adj, weight, bias=None,
                               T: int = 4, norm_groups: int = 1):
    # self.W = ONINorm(weight)  -- computed (and returned) but, exactly like
    # the PyTorch module, the matmul below uses the RAW weight.
    W_oni = oni_norm(weight, T=T, norm_groups=norm_groups)
    support = pallas_matmul(x, weight)         # torch.mm(x, self.weight)
    output = pallas_matmul(adj, support)       # torch.spmm(adj, support) (dense adj)
    if bias is not None:
        output = output + bias                 # trivial broadcast add
    return output, W_oni


# ---------------------------------------------------------------------------
# Pure-JAX references
# ---------------------------------------------------------------------------
def _oni_norm_ref(weight, T=5, norm_groups=1, eps=1e-5):
    hp = lax.Precision.HIGHEST
    G = norm_groups
    Z = weight.reshape(G, weight.shape[0] // G, -1).astype(jnp.float32)
    Zc = Z - Z.mean(axis=-1, keepdims=True)
    S = jnp.einsum('gnm,gkm->gnk', Zc, Zc, precision=hp)
    n = S.shape[-1]
    eye = jnp.eye(n, dtype=jnp.float32)[None]
    S = S + eps * eye
    norm_S = jnp.sqrt(jnp.sum(S * S, axis=(1, 2), keepdims=True))
    S = S / norm_S
    B = jnp.broadcast_to(eye, S.shape)
    for _ in range(T):
        B3 = jnp.einsum('gij,gjk->gik',
                        jnp.einsum('gij,gjk->gik', B, B, precision=hp),
                        B, precision=hp)
        B = 1.5 * B - 0.5 * jnp.einsum('gij,gjk->gik', B3, S, precision=hp)
    W = jnp.einsum('gij,gjm->gim', B, Zc, precision=hp) / jnp.sqrt(norm_S)
    return W.reshape(weight.shape).astype(weight.dtype)


if __name__ == "__main__":
    key = jax.random.PRNGKey(0)
    k1, k2, k3 = jax.random.split(key, 3)

    num_nodes, in_features, out_features = 64, 32, 16
    stdv = 1.0 / math.sqrt(out_features)

    x = jax.random.normal(k1, (num_nodes, in_features), dtype=jnp.float32)
    weight = jax.random.uniform(k2, (in_features, out_features),
                                dtype=jnp.float32, minval=-stdv, maxval=stdv)

    # Dense row-normalized adjacency (stand-in for adj_nor(adj) / torch.spmm).
    a = (jax.random.uniform(k3, (num_nodes, num_nodes)) < 0.1).astype(jnp.float32)
    a = jnp.minimum(a + a.T + jnp.eye(num_nodes, dtype=jnp.float32), 1.0)
    adj = a / jnp.sum(a, axis=1, keepdims=True)

    out, W_oni = graph_convolution1_forward(x, adj, weight, bias=None,
                                            T=4, norm_groups=1)
    out, W_oni = jax.block_until_ready((out, W_oni))

    # References.
    W_ref = _oni_norm_ref(weight, T=4, norm_groups=1)
    hp = lax.Precision.HIGHEST
    out_ref = jnp.dot(adj, jnp.dot(x, weight, precision=hp), precision=hp)

    if not jnp.allclose(W_oni, W_ref, atol=1e-4, rtol=1e-4):
        raise AssertionError("Pallas ONINorm does not match reference")
    if not jnp.allclose(out, out_ref, atol=1e-3, rtol=1e-3):
        raise AssertionError("Pallas GCN forward does not match reference")

    print("KERNEL_OK")
</pallas_src>

<mosaic_0001>
module attributes {stable_mosaic.version = 11 : i64} {
  func.func @_oni_kernel(%arg0: i32, %arg1: memref<1x32x128xf32, #tpu.memory_space<vmem>>, %arg2: memref<1x32x128xf32, #tpu.memory_space<vmem>>) attributes {dimension_semantics = [#tpu.dimension_semantics<parallel>], iteration_bounds = array<i64: 1>, scalar_prefetch = 0 : i64, scratch_operands = 0 : i64, tpu.core_type = #tpu.core_type<tc>, window_params = [{transform_indices = @transform_0, window_bounds = array<i64: 1, 32, 128>}, {transform_indices = @transform_1, window_bounds = array<i64: 1, 32, 128>}]} {
    %c0 = arith.constant 0 : index
    %c0_0 = arith.constant 0 : index
    %c0_1 = arith.constant 0 : index
    %0 = vector.load %arg1[%c0, %c0_0, %c0_1] : memref<1x32x128xf32, #tpu.memory_space<vmem>>, vector<1x32x128xf32>
    %cst = arith.constant dense<0.000000e+00> : vector<1x32xf32>
    %1 = vector.multi_reduction <add>, %0, %cst [2] : vector<1x32x128xf32> to vector<1x32xf32>
    %2 = vector.shape_cast %1 : vector<1x32xf32> to vector<1x32x1xf32>
    %cst_2 = arith.constant 6.250000e-02 : f32
    %3 = vector.broadcast %cst_2 : f32 to vector<1x32x1xf32>
    %4 = arith.mulf %2, %3 : vector<1x32x1xf32>
    %5 = vector.broadcast %4 : vector<1x32x1xf32> to vector<1x32x128xf32>
    %6 = arith.subf %0, %5 : vector<1x32x128xf32>
    %7 = tpu.iota {dimensions = array<i32: 1>} : vector<32x128xi32>
    %c16_i32 = arith.constant 16 : i32
    %8 = vector.broadcast %c16_i32 : i32 to vector<32x128xi32>
    %9 = arith.cmpi slt, %7, %8 : vector<32x128xi32>
    %10 = vector.shape_cast %9 : vector<32x128xi1> to vector<1x32x128xi1>
    %cst_3 = arith.constant 0.000000e+00 : f32
    %11 = vector.broadcast %cst_3 : f32 to vector<1x32x128xf32>
    %12 = arith.select %10, %6, %11 : vector<1x32x128xi1>, vector<1x32x128xf32>
    "tpu.trace_start"() <{level = 10 : i32, message = "gnm,gkm->gnk"}> : () -> ()
    %cst_4 = arith.constant dense<0.000000e+00> : vector<1x32x32xf32>
    %13 = tpu.matmul %12, %12, %cst_4 {dimension_numbers = #tpu.dot_dimension_numbers<[2], [2], [1], [1], [0, 0, 0, 1, 1, 1], [0], [0]>} : vector<1x32x128xf32>, vector<1x32x128xf32>, vector<1x32x32xf32> -> vector<1x32x32xf32>
    "tpu.trace_stop"() : () -> ()
    %14 = tpu.iota {dimensions = array<i32: 0>} : vector<32x32xi32>
    %15 = tpu.iota {dimensions = array<i32: 1>} : vector<32x32xi32>
    %16 = arith.cmpi eq, %14, %15 : vector<32x32xi32>
    %17 = arith.extui %16 : vector<32x32xi1> to vector<32x32xi32>
    %18 = arith.sitofp %17 : vector<32x32xi32> to vector<32x32xf32>
    %cst_5 = arith.constant 9.99999974E-6 : f32
    %19 = vector.broadcast %cst_5 : f32 to vector<32x32xf32>
    %20 = arith.mulf %19, %18 : vector<32x32xf32>
    %21 = vector.shape_cast %20 : vector<32x32xf32> to vector<1x32x32xf32>
    %22 = arith.addf %13, %21 : vector<1x32x32xf32>
    %23 = arith.mulf %22, %22 : vector<1x32x32xf32>
    %cst_6 = arith.constant dense<0.000000e+00> : vector<1xf32>
    %24 = vector.multi_reduction <add>, %23, %cst_6 [1, 2] : vector<1x32x32xf32> to vector<1xf32>
    %25 = vector.shape_cast %24 : vector<1xf32> to vector<1x1x1xf32>
    %26 = math.rsqrt %25 : vector<1x1x1xf32>
    %27 = vector.broadcast %26 : vector<1x1x1xf32> to vector<1x32x32xf32>
    %28 = arith.mulf %22, %27 : vector<1x32x32xf32>
    %29 = vector.shape_cast %18 : vector<32x32xf32> to vector<1x32x32xf32>
    %c0_i32 = arith.constant 0 : i32
    "tpu.trace_start"() <{level = 10 : i32, message = "gij,gjk->gik"}> : () -> ()
    %cst_7 = arith.constant dense<0.000000e+00> : vector<1x32x32xf32>
    %30 = tpu.matmul %29, %29, %cst_7 {dimension_numbers = #tpu.dot_dimension_numbers<[2], [1], [1], [2], [0, 0, 0, 1, 1, 2], [0], [0]>} : vector<1x32x32xf32>, vector<1x32x32xf32>, vector<1x32x32xf32> -> vector<1x32x32xf32>
    %cst_8 = arith.constant dense<0.000000e+00> : vector<1x32x32xf32>
    %31 = tpu.matmul %30, %29, %cst_8 {dimension_numbers = #tpu.dot_dimension_numbers<[2], [1], [1], [2], [0, 0, 0, 1, 1, 2], [0], [0]>} : vector<1x32x32xf32>, vector<1x32x32xf32>, vector<1x32x32xf32> -> vector<1x32x32xf32>
    "tpu.trace_stop"() : () -> ()
    %cst_9 = arith.constant 1.500000e+00 : f32
    %32 = vector.broadcast %cst_9 : f32 to vector<1x32x32xf32>
    %33 = arith.mulf %32, %29 : vector<1x32x32xf32>
    "tpu.trace_start"() <{level = 10 : i32, message = "gij,gjk->gik"}> : () -> ()
    %cst_10 = arith.constant dense<0.000000e+00> : vector<1x32x32xf32>
    %34 = tpu.matmul %31, %28, %cst_10 {dimension_numbers = #tpu.dot_dimension_numbers<[2], [1], [1], [2], [0, 0, 0, 1, 1, 2], [0], [0]>} : vector<1x32x32xf32>, vector<1x32x32xf32>, vector<1x32x32xf32> -> vector<1x32x32xf32>
    "tpu.trace_stop"() : () -> ()
    %cst_11 = arith.constant 5.000000e-01 : f32
    %35 = vector.broadcast %cst_11 : f32 to vector<1x32x32xf32>
    %36 = arith.mulf %35, %34 : vector<1x32x32xf32>
    %37 = arith.subf %33, %36 : vector<1x32x32xf32>
    %c1_i32 = arith.constant 1 : i32
    "tpu.trace_start"() <{level = 10 : i32, message = "gij,gjk->gik"}> : () -> ()
    %cst_12 = arith.constant dense<0.000000e+00> : vector<1x32x32xf32>
    %38 = tpu.matmul %37, %37, %cst_12 {dimension_numbers = #tpu.dot_dimension_numbers<[2], [1], [1], [2], [0, 0, 0, 1, 1, 2], [0], [0]>} : vector<1x32x32xf32>, vector<1x32x32xf32>, vector<1x32x32xf32> -> vector<1x32x32xf32>
    %cst_13 = arith.constant dense<0.000000e+00> : vector<1x32x32xf32>
    %39 = tpu.matmul %38, %37, %cst_13 {dimension_numbers = #tpu.dot_dimension_numbers<[2], [1], [1], [2], [0, 0, 0, 1, 1, 2], [0], [0]>} : vector<1x32x32xf32>, vector<1x32x32xf32>, vector<1x32x32xf32> -> vector<1x32x32xf32>
    "tpu.trace_stop"() : () -> ()
    %cst_14 = arith.constant 1.500000e+00 : f32
    %40 = vector.broadcast %cst_14 : f32 to vector<1x32x32xf32>
    %41 = arith.mulf %40, %37 : vector<1x32x32xf32>
    "tpu.trace_start"() <{level = 10 : i32, message = "gij,gjk->gik"}> : () -> ()
    %cst_15 = arith.constant dense<0.000000e+00> : vector<1x32x32xf32>
    %42 = tpu.matmul %39, %28, %cst_15 {dimension_numbers = #tpu.dot_dimension_numbers<[2], [1], [1], [2], [0, 0, 0, 1, 1, 2], [0], [0]>} : vector<1x32x32xf32>, vector<1x32x32xf32>, vector<1x32x32xf32> -> vector<1x32x32xf32>
    "tpu.trace_stop"() : () -> ()
    %cst_16 = arith.constant 5.000000e-01 : f32
    %43 = vector.broadcast %cst_16 : f32 to vector<1x32x32xf32>
    %44 = arith.mulf %43, %42 : vector<1x32x32xf32>
    %45 = arith.subf %41, %44 : vector<1x32x32xf32>
    %c2_i32 = arith.constant 2 : i32
    "tpu.trace_start"() <{level = 10 : i32, message = "gij,gjk->gik"}> : () -> ()
    %cst_17 = arith.constant dense<0.000000e+00> : vector<1x32x32xf32>
    %46 = tpu.matmul %45, %45, %cst_17 {dimension_numbers = #tpu.dot_dimension_numbers<[2], [1], [1], [2], [0, 0, 0, 1, 1, 2], [0], [0]>} : vector<1x32x32xf32>, vector<1x32x32xf32>, vector<1x32x32xf32> -> vector<1x32x32xf32>
    %cst_18 = arith.constant dense<0.000000e+00> : vector<1x32x32xf32>
    %47 = tpu.matmul %46, %45, %cst_18 {dimension_numbers = #tpu.dot_dimension_numbers<[2], [1], [1], [2], [0, 0, 0, 1, 1, 2], [0], [0]>} : vector<1x32x32xf32>, vector<1x32x32xf32>, vector<1x32x32xf32> -> vector<1x32x32xf32>
    "tpu.trace_stop"() : () -> ()
    %cst_19 = arith.constant 1.500000e+00 : f32
    %48 = vector.broadcast %cst_19 : f32 to vector<1x32x32xf32>
    %49 = arith.mulf %48, %45 : vector<1x32x32xf32>
    "tpu.trace_start"() <{level = 10 : i32, message = "gij,gjk->gik"}> : () -> ()
    %cst_20 = arith.constant dense<0.000000e+00> : vector<1x32x32xf32>
    %50 = tpu.matmul %47, %28, %cst_20 {dimension_numbers = #tpu.dot_dimension_numbers<[2], [1], [1], [2], [0, 0, 0, 1, 1, 2], [0], [0]>} : vector<1x32x32xf32>, vector<1x32x32xf32>, vector<1x32x32xf32> -> vector<1x32x32xf32>
    "tpu.trace_stop"() : () -> ()
    %cst_21 = arith.constant 5.000000e-01 : f32
    %51 = vector.broadcast %cst_21 : f32 to vector<1x32x32xf32>
    %52 = arith.mulf %51, %50 : vector<1x32x32xf32>
    %53 = arith.subf %49, %52 : vector<1x32x32xf32>
    %c3_i32 = arith.constant 3 : i32
    "tpu.trace_start"() <{level = 10 : i32, message = "gij,gjk->gik"}> : () -> ()
    %cst_22 = arith.constant dense<0.000000e+00> : vector<1x32x32xf32>
    %54 = tpu.matmul %53, %53, %cst_22 {dimension_numbers = #tpu.dot_dimension_numbers<[2], [1], [1], [2], [0, 0, 0, 1, 1, 2], [0], [0]>} : vector<1x32x32xf32>, vector<1x32x32xf32>, vector<1x32x32xf32> -> vector<1x32x32xf32>
    %cst_23 = arith.constant dense<0.000000e+00> : vector<1x32x32xf32>
    %55 = tpu.matmul %54, %53, %cst_23 {dimension_numbers = #tpu.dot_dimension_numbers<[2], [1], [1], [2], [0, 0, 0, 1, 1, 2], [0], [0]>} : vector<1x32x32xf32>, vector<1x32x32xf32>, vector<1x32x32xf32> -> vector<1x32x32xf32>
    "tpu.trace_stop"() : () -> ()
    %cst_24 = arith.constant 1.500000e+00 : f32
    %56 = vector.broadcast %cst_24 : f32 to vector<1x32x32xf32>
    %57 = arith.mulf %56, %53 : vector<1x32x32xf32>
    "tpu.trace_start"() <{level = 10 : i32, message = "gij,gjk->gik"}> : () -> ()
    %cst_25 = arith.constant dense<0.000000e+00> : vector<1x32x32xf32>
    %58 = tpu.matmul %55, %28, %cst_25 {dimension_numbers = #tpu.dot_dimension_numbers<[2], [1], [1], [2], [0, 0, 0, 1, 1, 2], [0], [0]>} : vector<1x32x32xf32>, vector<1x32x32xf32>, vector<1x32x32xf32> -> vector<1x32x32xf32>
    "tpu.trace_stop"() : () -> ()
    %cst_26 = arith.constant 5.000000e-01 : f32
    %59 = vector.broadcast %cst_26 : f32 to vector<1x32x32xf32>
    %60 = arith.mulf %59, %58 : vector<1x32x32xf32>
    %61 = arith.subf %57, %60 : vector<1x32x32xf32>
    %62 = math.sqrt %26 : vector<1x1x1xf32>
    %63 = vector.broadcast %62 : vector<1x1x1xf32> to vector<1x32x32xf32>
    %64 = arith.mulf %61, %63 : vector<1x32x32xf32>
    "tpu.trace_start"() <{level = 10 : i32, message = "gij,gjm->gim"}> : () -> ()
    %cst_27 = arith.constant dense<0.000000e+00> : vector<1x32x128xf32>
    %65 = tpu.matmul %64, %12, %cst_27 {dimension_numbers = #tpu.dot_dimension_numbers<[2], [1], [1], [2], [0, 0, 0, 1, 1, 2], [0], [0]>} : vector<1x32x32xf32>, vector<1x32x128xf32>, vector<1x32x128xf32> -> vector<1x32x128xf32>
    "tpu.trace_stop"() : () -> ()
    %c0_28 = arith.constant 0 : index
    %c0_29 = arith.constant 0 : index
    %c0_30 = arith.constant 0 : index
    %66 = vector.load %arg2[%c0_28, %c0_29, %c0_30] : memref<1x32x128xf32, #tpu.memory_space<vmem>>, vector<1x32x128xf32>
    tpu.vector_store %arg2[%c0_28, %c0_29, %c0_30], %65 {strides = array<i32>} : memref<1x32x128xf32, #tpu.memory_space<vmem>>, vector<1x32x128xf32>,
    return
  }
  func.func @transform_0(%arg0: i32) -> (i32, i32, i32) {
    %c0_i32 = arith.constant 0 : i32
    %c0_i32_0 = arith.constant 0 : i32
    %c0_i32_1 = arith.constant 0 : i32
    return %arg0, %c0_i32, %c0_i32_0 : i32, i32, i32
  }
  func.func @transform_1(%arg0: i32) -> (i32, i32, i32) {
    %c0_i32 = arith.constant 0 : i32
    %c0_i32_0 = arith.constant 0 : i32
    %c0_i32_1 = arith.constant 0 : i32
    return %arg0, %c0_i32, %c0_i32_0 : i32, i32, i32
  }
}

</mosaic_0001>

<bundles_post_ra>
// kernel: tpu_custom_call.1
= control target key start
LH: loop header
LB: loop body
LE: loop exit
PB: predicated region body
PF: predicated region fallthrough
CT: control target
= control target key end

     0   :  { %6 = vsyncpa [#allocation3], 0  ;;  %s2303_s0 = inlined_call_operand.hbm [shape: f32[1,32,128], index: 0, kind: input, shape index: {}]   ;;  %s2304_s1 = inlined_call_operand.hbm [shape: f32[1,32,128], index: 1, kind: output, shape index: {}]  }
   0x1   :  { %7 = vsyncpa [#allocation4], 0  ;;  %s2088_s6 = smov [#allocation2]   ;;  %s2040_s10 = scalar_lea.hbm %s2303_s0, 512 }
   0x2   :  { %s13_s7 = sshll.u32 %s2088_s6, 4  ;;  %p2041_p0 = scmp.ne.s32.totalorder %s2303_s0, %s2040_s10  ;;  %s14_s7 = int_to_ptr.vmem [resolvable:$true] %s13_s7 }
   0x3   :  { %p2044_p1 = scmp.lt.u32.totalorder %s2040_s10, %s2303_s0 }
   0x5   :  { %p2046_p2 = pnand %p2044_p1, %p2041_p0 }
   0x7   :  { %2049 = shalt.err (!%p2046_p2)
}
   0x8   :  { %s2050_s15 = scalar_lea.vmem %s14_s7, 512  ;;  %p2055_p4 = scmp.lt.s32.totalorder %s14_s7, %s14_s7 }
   0x9   :  { %p2051_p3 = scmp.ne.s32.totalorder %s14_s7, %s2050_s15  ;;  %p2056_p5 = scmp.lt.s32.totalorder %s2050_s15, %s2050_s15 }
   0xb   :  { %p2057_p6 = por %p2056_p5, %p2055_p4 }
   0xd   :  { %p2058_p7 = pnand %p2057_p6, %p2051_p3 }
   0xf   :  { %2061 = shalt.err (!%p2058_p7)
}
  0x10   :  { %s2089_s16 = smov 128   ;;  %s2090_s17 = smov 8  }
  0x11   :  { %19 = dma.hbm_to_vmem [thread:$0]  %s2303_s0, 512, %s14_s7, [#allocation3], %s2089_s16, %s2089_s16, %s2090_s17  }
  0x12   :  { %2084 = dma.done.wait [#allocation3], 512  }
  0x13   :  { %2085 = vsyncadd [#allocation3], 4294966784  ;;  %v43_v0 = vlaneseq  ;;  %vm160_vm0 = vcmask 261120   ;;  %v2091_v6 = vmov 0.0   ;;  %v23_v8 = vld [vmem:[#allocation2] sm:$0xff]  ;;  %v25_v9 = vld [vmem:[#allocation2 + $0x10] sm:$0xff] }
  0x14   :  { %27 = vadd.xlane.f32.xlu0 %v23_v8  ;;  %31 = vadd.xlane.f32.xlu1 %v25_v9  ;;  %v24_v10 = vld [vmem:[#allocation2 + $0x8] sm:$0xff]  ;;  %v26_v11 = vld [vmem:[#allocation2 + $0x18] sm:$0xff]  ;;  %v2092_v12 = vmov 1.0|1.0   ;;  %s2093_s0 = smov [#allocation5]  }
  0x15   :  { %v44_v1 = vand.u32 127, %v43_v0  ;;  %v51_v2 = vshrl.u32 %v43_v0, 7  ;;  %s1510_s20 = sshll.u32 %s2093_s0, 4  ;;  %s1511_s20 = int_to_ptr.vmem [resolvable:$true] %s1510_s20 }
  0x16   :  { %s2062_s21 = scalar_lea.vmem %s1511_s20, 512  ;;  %p2067_p9 = scmp.lt.s32.totalorder %s1511_s20, %s1511_s20 }
  0x17   :  { %v52_v3 = vadd.s32 8, %v51_v2  ;;  %vm55_vm1 = vcmp.eq.s32.totalorder %v51_v2, %v44_v1  ;;  %v53_v4 = vadd.s32 16, %v51_v2  ;;  %v54_v5 = vadd.s32 24, %v51_v2  ;;  %p2063_p8 = scmp.ne.s32.totalorder %s1511_s20, %s2062_s21  ;;  %p2068_p10 = scmp.lt.s32.totalorder %s2062_s21, %s2062_s21 }
  0x18   :  { %v2119_v7 = vsel %vm55_vm1, 1.0, %v2091_v6  ;;  %29 = vadd.xlane.f32.xlu0 %v24_v10  ;;  %33 = vadd.xlane.f32.xlu1 %v26_v11  ;;  %vm45_vm7 = vcmp.lt.s32.totalorder %v44_v1, 16 }
  0x19   :  { %vm56_vm2 = vcmp.eq.s32.totalorder %v52_v3, %v44_v1  ;;  %vm57_vm3 = vcmp.eq.s32.totalorder %v53_v4, %v44_v1  ;;  %vm58_vm4 = vcmp.eq.s32.totalorder %v54_v5, %v44_v1  ;;  %1732 = vmatprep.mubr.msk.f32.mxu1 %vm160_vm0, %v2119_v7  ;;  %vm2144_vm8 = vmpackc.low %vm45_vm7, %vm45_vm7  ;;  %v67_v36 = vmul.f32 1e-05, %v2119_v7  ;;  %p2069_p11 = por %p2068_p10, %p2067_p9 }
  0x1a   :  { %vm1918_vm5 = vmpackc.low %vm56_vm2, %vm55_vm1  ;;  %v2127_v13 = vsel %vm56_vm2, 1.0, %v2091_v6  ;;  %v2132_v14 = vsel %vm57_vm3, 1.0, %v2091_v6  ;;  %v2135_v15 = vsel %vm58_vm4, 1.0, %v2091_v6 }
  0x1b   :  { %1919 = vmatprep.subr.msk.bf16.mxu1 %vm1918_vm5, %v2092_v12  ;;  %vm1922_vm6 = vmpackc.low %vm58_vm4, %vm57_vm3  ;;  %v68_v35 = vmul.f32 1e-05, %v2127_v13  ;;  %v70_v40 = vmul.f32 1e-05, %v2135_v15  ;;  %v69_v42 = vmul.f32 1e-05, %v2132_v14  ;;  %p2070_p12 = pnand %p2069_p11, %p2063_p8 }
  0x1c   :  { %1921 = vmatpush3.bf16.msk.msra.mxu1 %vm1918_vm5, %v2092_v12 }
  0x1d   :  { %1923 = vmatprep.subr.msk.bf16.mxu1 %vm1922_vm6, %v2092_v12 }
  0x20   :  { %1925 = vmatpush3.bf16.msk.msra.mxu1 %vm1922_vm6, %v2092_v12 }
  0x21   :  { %1927 = vmatprep.subr.msk.bf16.mxu1 %vm1918_vm5, %v2092_v12 }
  0x23   :  { %1733 = vmatmul.mubr.msk.f32.vlgmr.msra.gmra.mrb[0].mxu1 %vm160_vm0, %v2127_v13 }
  0x24   :  { %1929 = vmatpush3.bf16.msk.msra.mxu1 %vm1918_vm5, %v2092_v12  ;;  %1735 = vmatprep.mubr.msk.f32.mxu1 %vm160_vm0, %v2132_v14 }
  0x25   :  { %1931 = vmatprep.subr.msk.bf16.mxu1 %vm1922_vm6, %v2092_v12 }
  0x27   :  { %1736 = vmatmul.mubr.msk.f32.gmra.mrb[2].mxu1 %vm160_vm0, %v2135_v15 }
  0x28   :  { %1933 = vmatpush3.bf16.msk.msra.mxu1 %vm1922_vm6, %v2092_v12 }
  0xa1   :  { %v28_v16 = vpop.xlane.xlu0 %27  ;;  %v32_v17 = vpop.xlane.xlu1 %31 }
  0xa2   :  { %v35_v18 = vmul.f32 0.0625, %v28_v16  ;;  %v37_v19 = vmul.f32 0.0625, %v32_v17  ;;  %v376_v16 = vmul.f32 1.5, %v2127_v13  ;;  %v375_v17 = vmul.f32 1.5, %v2119_v7 }
  0xa4   :  { %v39_v20 = vsub.f32 %v23_v8, %v35_v18  ;;  %v41_v23 = vsub.f32 %v25_v9, %v37_v19 }
  0xa5   :  { %v30_v21 = vpop.xlane.xlu0 %29  ;;  %v34_v22 = vpop.xlane.xlu1 %33 }
  0xa6   :  { %v36_v24 = vmul.f32 0.0625, %v30_v21  ;;  %1718 = vmatprep.mubr.msk.f32.mxu0 %vm45_vm7, %v39_v20  ;;  %v38_v25 = vmul.f32 0.0625, %v34_v22 }
  0xa8   :  { %v40_v26 = vsub.f32 %v24_v10, %v36_v24  ;;  %v42_v27 = vsub.f32 %v26_v11, %v38_v25 }
  0xaa   :  { %v2148_v29 = vpack.c.bf16 %v40_v26, %v39_v20  ;;  %v2150_v30 = vpack.c.bf16 %v42_v27, %v41_v23 }
  0xac   :  { %1908 = vmatprep.subr.msk.bf16.mxu0 %vm2144_vm8, %v2148_v29 }
  0xad   :  { %1911 = vmatpush3.bf16.xpose.msk.msra.mxu0 %vm2144_vm8, %v2148_v29 }
  0xae   :  { %1914 = vmatprep.subr.msk.bf16.mxu0 %vm2144_vm8, %v2150_v30 }
  0xb5   :  { %1917 = vmatpush3.bf16.xpose.msk.msra.mxu0 %vm2144_vm8, %v2150_v30 }
  0xbc   :  { %1719 = vmatmul.mubr.msk.f32.vlgmr.msra.gmra.mrb[0].mxu0 %vm45_vm7, %v40_v26  ;;  %v377_v26 = vmul.f32 1.5, %v2132_v14 }
  0xbd   :  { %1721 = vmatprep.mubr.msk.f32.mxu0 %vm45_vm7, %v41_v23  ;;  %v378_v23 = vmul.f32 1.5, %v2135_v15 }
  0xc0   :  { %1722 = vmatmul.mubr.msk.f32.gmra.mrb[2].mxu0 %vm45_vm7, %v42_v27 }
  0xf6   :  { %v1734_v31 = vpop.f32.mrb[0].mxu1 }
  0xf7   :  { %v259_v32 = vpop.f32.mrb[1].mxu1 }
  0xf8   :  { %1746 = vmatprep.mubr.msk.f32.mxu1 %vm160_vm0, %v259_v32 }
  0xf9   :  { %1747 = vmatmul.mubr.msk.f32.vlgmr.msra.gmra.mrb[4].mxu1 %vm160_vm0, %v1734_v31 }
  0xfa   :  { %v1737_v33 = vpop.f32.mrb[2].mxu1 }
  0xfb   :  { %v269_v34 = vpop.f32.mrb[3].mxu1 }
  0xfc   :  { %1749 = vmatprep.mubr.msk.f32.mxu1 %vm160_vm0, %v269_v34 }
  0xfd   :  { %1750 = vmatmul.mubr.msk.f32.gmra.mrb[6].mxu1 %vm160_vm0, %v1737_v33 }
 0x18f   :  { %v1720_v37 = vpop.f32.mrb[0].mxu0 }
 0x190   :  { %v143_v38 = vadd.f32 %v1720_v37, %v68_v35  ;;  %v137_v39 = vpop.f32.mrb[1].mxu0 }
 0x191   :  { %v138_v41 = vadd.f32 %v137_v39, %v67_v36 }
 0x192   :  { %v157_v43 = vmul.f32 %v143_v38, %v143_v38 }
 0x193   :  { %v156_v44 = vmul.f32 %v138_v41, %v138_v41  ;;  %v1723_v45 = vpop.f32.mrb[2].mxu0 }
 0x194   :  { %v153_v46 = vadd.f32 %v1723_v45, %v70_v40  ;;  %v147_v47 = vpop.f32.mrb[3].mxu0  ;;  %v162_v48 = vsel %vm160_vm0, %v157_v43, 0.0 }
 0x195   :  { %v161_v49 = vsel %vm160_vm0, %v156_v44, 0.0  ;;  %v148_v50 = vadd.f32 %v147_v47, %v69_v42 }
 0x196   :  { %v159_v51 = vmul.f32 %v153_v46, %v153_v46  ;;  %v163_v53 = vadd.f32 %v162_v48, %v161_v49 }
 0x197   :  { %v158_v52 = vmul.f32 %v148_v50, %v148_v50 }
 0x198   :  { %v166_v56 = vsel %vm160_vm0, %v159_v51, 0.0 }
 0x199   :  { %v164_v54 = vsel %vm160_vm0, %v158_v52, 0.0 }
 0x19a   :  { %v165_v55 = vadd.f32 %v164_v54, %v163_v53 }
 0x19c   :  { %v167_v57 = vadd.f32 %v166_v56, %v165_v55 }
 0x19e   :  { %168 = vadd.xlane.f32.xlu0 %v167_v57 }
 0x1cc   :  { %v1748_v58 = vpop.f32.mrb[4].mxu1 }
 0x1cd   :  { %v356_v59 = vpop.f32.mrb[5].mxu1 }
 0x1ce   :  { %1760 = vmatprep.mubr.msk.f32.mxu0 %vm160_vm0, %v356_v59 }
 0x1d0   :  { %v1751_v60 = vpop.f32.mrb[6].mxu1 }
 0x1d1   :  { %v366_v61 = vpop.f32.mrb[7].mxu1 }
 0x22b   :  { %v169_v62 = vpop.xlane.xlu0 %168 }
 0x22c   :  { %v170_v63 = vrot.slane %v169_v62, 4 }
 0x22e   :  { %v171_v0 = vadd.f32 %v170_v63, %v169_v62 }
 0x230   :  { %v172_v1 = vrot.slane %v171_v0, 2 }
 0x232   :  { %v173_v2 = vadd.f32 %v172_v1, %v171_v0 }
 0x234   :  { %v174_v3 = vrot.slane %v173_v2, 1 }
 0x236   :  { %v175_v4 = vadd.f32 %v174_v3, %v173_v2 }
 0x238   :  { %2036 = vrsqrt.f32 %v175_v4 }
 0x242   :  { %v2180_v5 = vpop.eup %2036 }
 0x243   :  { %v177_v6 = vmul.f32 %v2180_v5, %v138_v41  ;;  %v178_v8 = vmul.f32 %v2180_v5, %v143_v38  ;;  %v179_v9 = vmul.f32 %v2180_v5, %v148_v50  ;;  %v180_v10 = vmul.f32 %v2180_v5, %v153_v46 }
 0x244   :  { %2038 = vrsqrt.f32 %v2180_v5  ;;  %vm1395_vm9 = vcmp.eq.f32.partialorder %v2180_v5, inf  ;;  %vm1397_vm10 = vcmp.eq.f32.partialorder %v2180_v5, 0.0 }
 0x245   :  { %v2186_v11 = vpack.c.bf16 %v178_v8, %v177_v6  ;;  %v2189_v12 = vpack.c.bf16 %v180_v10, %v179_v9 }
 0x247   :  { %1935 = vmatprep.subr.bf16.mxu0 %v2186_v11 }
 0x248   :  { %1937 = vmatpush3.bf16.msra.mxu0 %v2186_v11 }
 0x249   :  { %1939 = vmatprep.subr.bf16.mxu0 %v2189_v12 }
 0x24c   :  { %1941 = vmatpush3.bf16.msra.mxu0 %v2189_v12 }
 0x24f   :  { %1761 = vmatmul.mubr.msk.f32.vlgmr.msra.gmra.mrb[4].mxu0 %vm160_vm0, %v1748_v58 }
 0x250   :  { %1763 = vmatprep.mubr.msk.f32.mxu0 %vm160_vm0, %v366_v61 }
 0x253   :  { %1764 = vmatmul.mubr.msk.f32.gmra.mrb[6].mxu0 %vm160_vm0, %v1751_v60 }
 0x322   :  { %v1762_v18 = vpop.f32.mrb[4].mxu0 }
 0x323   :  { %v477_v19 = vmul.f32 0.5, %v1762_v18  ;;  %v457_v20 = vpop.f32.mrb[5].mxu0 }
 0x324   :  { %v476_v21 = vmul.f32 0.5, %v457_v20 }
 0x325   :  { %v481_v22 = vsub.f32 %v376_v16, %v477_v19 }
 0x326   :  { %v480_v24 = vsub.f32 %v375_v17, %v476_v21  ;;  %v1765_v25 = vpop.f32.mrb[6].mxu0 }
 0x327   :  { %v479_v27 = vmul.f32 0.5, %v1765_v25  ;;  %v467_v31 = vpop.f32.mrb[7].mxu0  ;;  %v679_v42 = vmul.f32 1.5, %v481_v22 }
 0x328   :  { %v1942_v32 = vpack.c.bf16 %v481_v22, %v480_v24  ;;  %v478_v33 = vmul.f32 0.5, %v467_v31  ;;  %1774 = vmatprep.mubr.msk.f32.mxu1 %vm160_vm0, %v480_v24  ;;  %v678_v45 = vmul.f32 1.5, %v480_v24 }
 0x329   :  { %v483_v13 = vsub.f32 %v378_v23, %v479_v27 }
 0x32a   :  { %v482_v34 = vsub.f32 %v377_v26, %v478_v33  ;;  %1943 = vmatprep.subr.bf16.mxu1 %v1942_v32  ;;  %1951 = vmatprep.subr.bf16.mxu0 %v1942_v32 }
 0x32b   :  { %1945 = vmatpush3.bf16.msra.mxu1 %v1942_v32  ;;  %1953 = vmatpush3.bf16.msra.mxu0 %v1942_v32  ;;  %v681_v50 = vmul.f32 1.5, %v483_v13 }
 0x32c   :  { %v1946_v7 = vpack.c.bf16 %v483_v13, %v482_v34  ;;  %v680_v54 = vmul.f32 1.5, %v482_v34 }
 0x32e   :  { %1947 = vmatprep.subr.bf16.mxu1 %v1946_v7  ;;  %1955 = vmatprep.subr.bf16.mxu0 %v1946_v7 }
 0x32f   :  { %1949 = vmatpush3.bf16.msra.mxu1 %v1946_v7  ;;  %1957 = vmatpush3.bf16.msra.mxu0 %v1946_v7 }
 0x330   :  { %1959 = vmatprep.subr.bf16.mxu1 %v2186_v11 }
 0x332   :  { %1775 = vmatmul.mubr.msk.f32.vlgmr.msra.gmra.mrb[8].mxu1 %vm160_vm0, %v481_v22 }
 0x333   :  { %1777 = vmatprep.mubr.msk.f32.mxu1 %vm160_vm0, %v482_v34  ;;  %1961 = vmatpush3.bf16.msra.mxu1 %v2186_v11 }
 0x334   :  { %1963 = vmatprep.subr.bf16.mxu1 %v2189_v12 }
 0x336   :  { %1778 = vmatmul.mubr.msk.f32.gmra.mrb[10].mxu1 %vm160_vm0, %v483_v13 }
 0x337   :  { %1965 = vmatpush3.bf16.msra.mxu1 %v2189_v12 }
 0x405   :  { %v1776_v14 = vpop.f32.mrb[8].mxu1 }
 0x406   :  { %v562_v15 = vpop.f32.mrb[9].mxu1 }
 0x407   :  { %1788 = vmatprep.mubr.msk.f32.mxu0 %vm160_vm0, %v562_v15 }
 0x408   :  { %1789 = vmatmul.mubr.msk.f32.vlgmr.msra.gmra.mrb[8].mxu0 %vm160_vm0, %v1776_v14  ;;  %v2039_v14 = vpop.eup %2038 }
 0x409   :  { %v1779_v35 = vpop.f32.mrb[10].mxu1  ;;  %v1394_v15 = vmul.f32 %v2039_v14, %v2180_v5 }
 0x40a   :  { %v572_v36 = vpop.f32.mrb[11].mxu1 }
 0x40b   :  { %1791 = vmatprep.mubr.msk.f32.mxu0 %vm160_vm0, %v572_v36 }
 0x40c   :  { %1792 = vmatmul.mubr.msk.f32.gmra.mrb[10].mxu0 %vm160_vm0, %v1779_v35 }
 0x4db   :  { %v1790_v37 = vpop.f32.mrb[8].mxu0 }
 0x4dc   :  { %v659_v38 = vpop.f32.mrb[9].mxu0 }
 0x4dd   :  { %1802 = vmatprep.mubr.msk.f32.mxu1 %vm160_vm0, %v659_v38 }
 0x4de   :  { %1803 = vmatmul.mubr.msk.f32.vlgmr.msra.gmra.mrb[12].mxu1 %vm160_vm0, %v1790_v37  ;;  %v1396_v37 = vsel %vm1395_vm9, %v2180_v5, %v1394_v15 }
 0x4df   :  { %v1793_v39 = vpop.f32.mrb[10].mxu0 }
 0x4e0   :  { %v669_v40 = vpop.f32.mrb[11].mxu0 }
 0x4e1   :  { %1805 = vmatprep.mubr.msk.f32.mxu1 %vm160_vm0, %v669_v40 }
 0x4e2   :  { %1806 = vmatmul.mubr.msk.f32.gmra.mrb[14].mxu1 %vm160_vm0, %v1793_v39  ;;  %v1398_v39 = vand.u32 2147483648, %v2180_v5 }
 0x4e4   :  { %v1399_v28 = vsel %vm1397_vm10, %v1398_v39, %v1396_v37 }
 0x5b1   :  { %v1804_v41 = vpop.f32.mrb[12].mxu1 }
 0x5b2   :  { %v780_v43 = vmul.f32 0.5, %v1804_v41  ;;  %v760_v44 = vpop.f32.mrb[13].mxu1 }
 0x5b3   :  { %v779_v46 = vmul.f32 0.5, %v760_v44 }
 0x5b4   :  { %v784_v47 = vsub.f32 %v679_v42, %v780_v43 }
 0x5b5   :  { %v783_v48 = vsub.f32 %v678_v45, %v779_v46  ;;  %v1807_v49 = vpop.f32.mrb[14].mxu1 }
 0x5b6   :  { %v782_v51 = vmul.f32 0.5, %v1807_v49  ;;  %v770_v52 = vpop.f32.mrb[15].mxu1  ;;  %v982_v4 = vmul.f32 1.5, %v784_v47 }
 0x5b7   :  { %v1966_v53 = vpack.c.bf16 %v784_v47, %v783_v48  ;;  %v781_v55 = vmul.f32 0.5, %v770_v52  ;;  %1816 = vmatprep.mubr.msk.f32.mxu0 %vm160_vm0, %v783_v48  ;;  %v981_v9 = vmul.f32 1.5, %v783_v48 }
 0x5b8   :  { %v786_v56 = vsub.f32 %v681_v50, %v782_v51 }
 0x5b9   :  { %v785_v57 = vsub.f32 %v680_v54, %v781_v55  ;;  %1967 = vmatprep.subr.bf16.mxu0 %v1966_v53  ;;  %1975 = vmatprep.subr.bf16.mxu1 %v1966_v53 }
 0x5ba   :  { %1969 = vmatpush3.bf16.msra.mxu0 %v1966_v53  ;;  %1977 = vmatpush3.bf16.msra.mxu1 %v1966_v53  ;;  %v984_v19 = vmul.f32 1.5, %v786_v56 }
 0x5bb   :  { %v1970_v58 = vpack.c.bf16 %v786_v56, %v785_v57  ;;  %v983_v23 = vmul.f32 1.5, %v785_v57 }
 0x5bd   :  { %1971 = vmatprep.subr.bf16.mxu0 %v1970_v58  ;;  %1979 = vmatprep.subr.bf16.mxu1 %v1970_v58 }
 0x5be   :  { %1973 = vmatpush3.bf16.msra.mxu0 %v1970_v58  ;;  %1981 = vmatpush3.bf16.msra.mxu1 %v1970_v58 }
 0x5bf   :  { %1983 = vmatprep.subr.bf16.mxu0 %v2186_v11 }
 0x5c1   :  { %1817 = vmatmul.mubr.msk.f32.vlgmr.msra.gmra.mrb[12].mxu0 %vm160_vm0, %v784_v47 }
 0x5c2   :  { %1819 = vmatprep.mubr.msk.f32.mxu0 %vm160_vm0, %v785_v57  ;;  %1985 = vmatpush3.bf16.msra.mxu0 %v2186_v11 }
 0x5c3   :  { %1987 = vmatprep.subr.bf16.mxu0 %v2189_v12 }
 0x5c5   :  { %1820 = vmatmul.mubr.msk.f32.gmra.mrb[14].mxu0 %vm160_vm0, %v786_v56 }
 0x5c6   :  { %1989 = vmatpush3.bf16.msra.mxu0 %v2189_v12 }
 0x694   :  { %v1818_v59 = vpop.f32.mrb[12].mxu0 }
 0x695   :  { %v865_v60 = vpop.f32.mrb[13].mxu0 }
 0x696   :  { %1830 = vmatprep.mubr.msk.f32.mxu1 %vm160_vm0, %v865_v60 }
 0x697   :  { %1831 = vmatmul.mubr.msk.f32.vlgmr.msra.gmra.mrb[16].mxu1 %vm160_vm0, %v1818_v59 }
 0x698   :  { %v1821_v61 = vpop.f32.mrb[14].mxu0 }
 0x699   :  { %v875_v62 = vpop.f32.mrb[15].mxu0 }
 0x69a   :  { %1833 = vmatprep.mubr.msk.f32.mxu1 %vm160_vm0, %v875_v62 }
 0x69b   :  { %1834 = vmatmul.mubr.msk.f32.gmra.mrb[18].mxu1 %vm160_vm0, %v1821_v61 }
 0x76a   :  { %v1832_v63 = vpop.f32.mrb[16].mxu1 }
 0x76b   :  { %v962_v0 = vpop.f32.mrb[17].mxu1 }
 0x76c   :  { %1844 = vmatprep.mubr.msk.f32.mxu0 %vm160_vm0, %v962_v0 }
 0x76d   :  { %1845 = vmatmul.mubr.msk.f32.vlgmr.msra.gmra.mrb[16].mxu0 %vm160_vm0, %v1832_v63 }
 0x76e   :  { %v1835_v1 = vpop.f32.mrb[18].mxu1 }
 0x76f   :  { %v972_v2 = vpop.f32.mrb[19].mxu1 }
 0x770   :  { %1847 = vmatprep.mubr.msk.f32.mxu0 %vm160_vm0, %v972_v2 }
 0x771   :  { %1848 = vmatmul.mubr.msk.f32.gmra.mrb[18].mxu0 %vm160_vm0, %v1835_v1 }
 0x840   :  { %v1846_v3 = vpop.f32.mrb[16].mxu0 }
 0x841   :  { %v1083_v6 = vmul.f32 0.5, %v1846_v3  ;;  %v1063_v8 = vpop.f32.mrb[17].mxu0 }
 0x842   :  { %v1082_v10 = vmul.f32 0.5, %v1063_v8 }
 0x843   :  { %v1087_v16 = vsub.f32 %v982_v4, %v1083_v6 }
 0x844   :  { %v1086_v17 = vsub.f32 %v981_v9, %v1082_v10  ;;  %v1849_v18 = vpop.f32.mrb[18].mxu0 }
 0x845   :  { %v1085_v20 = vmul.f32 0.5, %v1849_v18  ;;  %v1073_v21 = vpop.f32.mrb[19].mxu0  ;;  %v1285_v35 = vmul.f32 1.5, %v1087_v16 }
 0x846   :  { %v1990_v22 = vpack.c.bf16 %v1087_v16, %v1086_v17  ;;  %v1084_v24 = vmul.f32 0.5, %v1073_v21  ;;  %1858 = vmatprep.mubr.msk.f32.mxu1 %vm160_vm0, %v1086_v17  ;;  %v1284_v40 = vmul.f32 1.5, %v1086_v17 }
 0x847   :  { %v1089_v25 = vsub.f32 %v984_v19, %v1085_v20 }
 0x848   :  { %v2234_v26 = vsub.f32 %v983_v23, %v1084_v24  ;;  %1991 = vmatprep.subr.bf16.mxu1 %v1990_v22  ;;  %1999 = vmatprep.subr.bf16.mxu0 %v1990_v22 }
 0x849   :  { %1993 = vmatpush3.bf16.msra.mxu1 %v1990_v22  ;;  %2001 = vmatpush3.bf16.msra.mxu0 %v1990_v22  ;;  %v1287_v45 = vmul.f32 1.5, %v1089_v25 }
 0x84a   :  { %v1994_v27 = vpack.c.bf16 %v1089_v25, %v2234_v26  ;;  %v1286_v49 = vmul.f32 1.5, %v2234_v26 }
 0x84c   :  { %1995 = vmatprep.subr.bf16.mxu1 %v1994_v27  ;;  %2003 = vmatprep.subr.bf16.mxu0 %v1994_v27 }
 0x84d   :  { %1997 = vmatpush3.bf16.msra.mxu1 %v1994_v27  ;;  %2005 = vmatpush3.bf16.msra.mxu0 %v1994_v27 }
 0x84e   :  { %2007 = vmatprep.subr.bf16.mxu1 %v2186_v11  ;;  %2016 = vmatprep.subr.msk.bf16.mxu0 %vm2144_vm8, %v2148_v29 }
 0x850   :  { %1859 = vmatmul.mubr.msk.f32.vlgmr.msra.gmra.mrb[20].mxu1 %vm160_vm0, %v1087_v16 }
 0x851   :  { %1861 = vmatprep.mubr.msk.f32.mxu1 %vm160_vm0, %v2234_v26  ;;  %2009 = vmatpush3.bf16.msra.mxu1 %v2186_v11 }
 0x852   :  { %2011 = vmatprep.subr.bf16.mxu1 %v2189_v12 }
 0x854   :  { %1862 = vmatmul.mubr.msk.f32.gmra.mrb[22].mxu1 %vm160_vm0, %v1089_v25 }
 0x855   :  { %2013 = vmatpush3.bf16.msra.mxu1 %v2189_v12 }
 0x856   :  { %2026 = vmatprep.subr.msk.bf16.mxu1 %vm2144_vm8, %v2148_v29 }
 0x923   :  { %v1860_v31 = vpop.f32.mrb[20].mxu1 }
 0x924   :  { %v1168_v32 = vpop.f32.mrb[21].mxu1 }
 0x925   :  { %1872 = vmatprep.mubr.msk.f32.mxu0 %vm160_vm0, %v1168_v32 }
 0x926   :  { %1873 = vmatmul.mubr.msk.f32.vlgmr.msra.gmra.mrb[20].mxu0 %vm160_vm0, %v1860_v31 }
 0x927   :  { %2019 = vmatpush3.bf16.msk.msra.mxu0 %vm2144_vm8, %v2148_v29  ;;  %v1863_v11 = vpop.f32.mrb[22].mxu1 }
 0x928   :  { %2022 = vmatprep.subr.msk.bf16.mxu0 %vm2144_vm8, %v2150_v30  ;;  %v1178_v12 = vpop.f32.mrb[23].mxu1 }
 0x929   :  { %1875 = vmatprep.mubr.msk.f32.mxu0 %vm160_vm0, %v1178_v12 }
 0x92a   :  { %1876 = vmatmul.mubr.msk.f32.gmra.mrb[22].mxu0 %vm160_vm0, %v1863_v11 }
 0x92b   :  { %2025 = vmatpush3.bf16.msk.msra.mxu0 %vm2144_vm8, %v2150_v30 }
 0x9f9   :  { %v1874_v33 = vpop.f32.mrb[20].mxu0 }
 0x9fa   :  { %v1265_v13 = vpop.f32.mrb[21].mxu0 }
 0x9fb   :  { %1886 = vmatprep.mubr.msk.f32.mxu1 %vm160_vm0, %v1265_v13 }
 0x9fc   :  { %1887 = vmatmul.mubr.msk.f32.vlgmr.msra.gmra.mrb[24].mxu1 %vm160_vm0, %v1874_v33 }
 0x9fd   :  { %2028 = vmatpush3.bf16.msk.msra.mxu1 %vm2144_vm8, %v2148_v29  ;;  %v1877_v34 = vpop.f32.mrb[22].mxu0 }
 0x9fe   :  { %2027 = vmatprep.subr.msk.bf16.mxu1 %vm2144_vm8, %v2150_v30  ;;  %v1275_v7 = vpop.f32.mrb[23].mxu0 }
 0x9ff   :  { %1889 = vmatprep.mubr.msk.f32.mxu1 %vm160_vm0, %v1275_v7 }
 0xa00   :  { %1890 = vmatmul.mubr.msk.f32.gmra.mrb[26].mxu1 %vm160_vm0, %v1877_v34 }
 0xa01   :  { %2029 = vmatpush3.bf16.msk.msra.mxu1 %vm2144_vm8, %v2150_v30 }
 0xacf   :  { %v1888_v29 = vpop.f32.mrb[24].mxu1 }
 0xad0   :  { %v1386_v36 = vmul.f32 0.5, %v1888_v29  ;;  %v1366_v38 = vpop.f32.mrb[25].mxu1 }
 0xad1   :  { %v1385_v41 = vmul.f32 0.5, %v1366_v38 }
 0xad2   :  { %v1390_v42 = vsub.f32 %v1285_v35, %v1386_v36 }
 0xad3   :  { %v1389_v30 = vsub.f32 %v1284_v40, %v1385_v41  ;;  %v1891_v43 = vpop.f32.mrb[26].mxu1 }
 0xad4   :  { %v1401_v44 = vmul.f32 %v1399_v28, %v1390_v42  ;;  %v1388_v46 = vmul.f32 0.5, %v1891_v43  ;;  %v1376_v47 = vpop.f32.mrb[27].mxu1 }
 0xad5   :  { %v1400_v48 = vmul.f32 %v1399_v28, %v1389_v30  ;;  %v1387_v50 = vmul.f32 0.5, %v1376_v47 }
 0xad6   :  { %v1392_v51 = vsub.f32 %v1287_v45, %v1388_v46 }
 0xad7   :  { %v1391_v52 = vsub.f32 %v1286_v49, %v1387_v50  ;;  %1900 = vmatprep.mubr.msk.f32.mxu0 %vm160_vm0, %v1400_v48 }
 0xad8   :  { %v1403_v53 = vmul.f32 %v1399_v28, %v1392_v51  ;;  %1901 = vmatmul.mubr.msk.f32.vlgmr.msra.gmra.mrb[24].mxu0 %vm160_vm0, %v1401_v44 }
 0xad9   :  { %v1402_v54 = vmul.f32 %v1399_v28, %v1391_v52 }
 0xadb   :  { %1903 = vmatprep.mubr.msk.f32.mxu1 %vm160_vm0, %v1402_v54 }
 0xadc   :  { %1904 = vmatmul.mubr.msk.f32.vlgmr.msra.gmra.mrb[28].mxu1 %vm160_vm0, %v1403_v53 }
 0xbab   :  { %v1902_v5 = vpop.f32.mrb[24].mxu0 }
 0xbac   :  { %1502 = vst [vmem:[#allocation5 + $0x8] sm:$0xff] %v1902_v5  ;;  %v1482_v55 = vpop.f32.mrb[25].mxu0 }
 0xbad   :  { %1501 = vst [vmem:[#allocation5] sm:$0xff] %v1482_v55 }
 0xbaf   :  { %v1905_v56 = vpop.f32.mrb[28].mxu1 }
 0xbb0   :  { %1504 = vst [vmem:[#allocation5 + $0x18] sm:$0xff] %v1905_v56  ;;  %v1492_v57 = vpop.f32.mrb[29].mxu1 }
 0xbb1   :  { %1503 = vst [vmem:[#allocation5 + $0x10] sm:$0xff] %v1492_v57 }
 0xbb2   :  { %2073 = shalt.err (!%p2070_p12)
}
 0xbb3   :  { %s2074_s24 = scalar_lea.hbm %s2304_s1, 512 }
 0xbb4   :  { %p2075_p13 = scmp.ne.s32.totalorder %s2304_s1, %s2074_s24  ;;  %p2078_p0 = scmp.lt.u32.totalorder %s2074_s24, %s2304_s1 }
 0xbb6   :  { %p2080_p1 = pnand %p2078_p0, %p2075_p13 }
 0xbb8   :  { %2083 = shalt.err (!%p2080_p1)
}
 0xbb9   :  { %1516 = dma.vmem_to_hbm [thread:$0]  %s1511_s20, 512, %s2304_s1, [#allocation4], %s2089_s16, %s2089_s16, %s2090_s17  }
 0xbba   :  { %2086 = dma.done.wait [#allocation4], 512  }
 0xbbb   :  { %2087 = vsyncadd [#allocation4], 4294966784 }
 0xbbc   :  { %1520 = vsyncpa [#allocation3], 1 }
 0xbbd   :  { %1521 = vsyncpa [#allocation4], 1 }

</bundles_post_ra>
